<compile_context>
chip_gen: v7x
topology: tpu7x:2x2x1
jax: 0.10.0
libtpu: 0.0.40
codegen_flags: <defaults>
</compile_context>

<pallas_src>
import functools

import jax
import jax.numpy as jnp
from jax.experimental import pallas as pl
from jax.experimental.pallas import tpu as pltpu


def _round_up(x, m):
    return (x + m - 1) // m * m


def _user_delta_kernel(x_ref, w1_ref, b1_ref, w2_ref, b2_ref, o_ref, h_ref):
    # x_ref:  (bm, C_p)   bf16
    # w1_ref: (C_p, H_p)  bf16     b1_ref: (1, H_p)  f32
    # w2_ref: (H_p, bn)   bf16     b2_ref: (1, bn)   f32
    # o_ref:  (bm, bn)    code.dtype
    # h_ref:  (bm, H_p)   bf16 scratch, persists across the vocab (j) axis
    @pl.when(pl.program_id(1) == 0)
    def _():
        # First matmul: bf16 x bf16 -> f32 MXU accumulate.
        h = jnp.dot(x_ref[...], w1_ref[...],
                    preferred_element_type=jnp.float32) + b1_ref[...]
        # Bias + ReLU stay in f32 on the VPU (v5e has no bf16 VALU); a single
        # pack-cast to bf16 feeds the second MXU matmul.
        h_ref[...] = jnp.maximum(h, 0.0).astype(h_ref.dtype)

    out = jnp.dot(h_ref[...], w2_ref[...], preferred_element_type=jnp.float32)
    o_ref[...] = (out + b2_ref[...]).astype(o_ref.dtype)


def prepare_params(params):
    """One-time prep: pad weights to lane-dense shapes and cast to bf16.

    Call this once (e.g. at init) and reuse the result for every forward —
    this keeps the per-call wrapper free of weight pad/cast XLA ops.
    """
    w1, b1, w2, b2 = params
    C, H = w1.shape
    V = w2.shape[1]

    C_p = _round_up(C, 128)
    H_p = _round_up(H, 128)
    V_p = _round_up(V, 128)
    # Vocab tile width: whole V when small, 1024-wide lane tiles otherwise so
    # W2 / the f32 output tile never blow past VMEM (v7x: 64 MiB total).
    block_n = V_p if V_p <= 2048 else 1024
    V_p = _round_up(V_p, block_n)

    bf16, f32 = jnp.bfloat16, jnp.float32
    w1_p = jnp.zeros((C_p, H_p), bf16).at[:C, :H].set(w1.astype(bf16))
    w2_p = jnp.zeros((H_p, V_p), bf16).at[:H, :V].set(w2.astype(bf16))
    b1_p = jnp.zeros((1, H_p), f32).at[:, :H].set(jnp.reshape(b1, (1, H)).astype(f32))
    b2_p = jnp.zeros((1, V_p), f32).at[:, :V].set(jnp.reshape(b2, (1, V)).astype(f32))

    return {
        "w1": w1_p, "b1": b1_p, "w2": w2_p, "b2": b2_p,
        "dims": (C, H, V), "block_n": block_n,
    }


def user_delta_forward(code, d_constraint, prepared, *, block_m=None,
                       vmem_limit_bytes=None):
    """Fused MLP forward (Linear -> ReLU -> Linear) as one Pallas kernel.

    `prepared` is the output of `prepare_params`. d_constraint is ignored
    (matches the PyTorch module's forward).
    """
    del d_constraint
    w1_p, b1_p, w2_p, b2_p = (prepared["w1"], prepared["b1"],
                              prepared["w2"], prepared["b2"])
    C, H, V = prepared["dims"]
    block_n = prepared["block_n"]
    C_p, H_p = w1_p.shape
    V_p = w2_p.shape[1]

    B = code.shape[0]
    bf16 = jnp.bfloat16
    out_dtype = code.dtype

    # Batch tiling: only the sublane multiple (16 for the bf16 x tile); the
    # lane (last) dim is the only one that needs 128-alignment.
    if block_m is None:
        block_m = min(256, _round_up(B, 16))
        # Keep >= 2 parallel grid steps for v7x's second TensorCore when the
        # batch is big enough to amortize the ~0.35us per-step overhead.
        if B >= 32 and _round_up(B, block_m) == block_m:
            block_m = max(16, _round_up(block_m // 2, 16))
    else:
        block_m = _round_up(block_m, 16)
    B_p = _round_up(B, block_m)

    # Pad / cast the activation only if actually needed.
    if B_p == B and C_p == C and code.dtype == bf16:
        code_p = code
    else:
        code_p = jnp.zeros((B_p, C_p), bf16).at[:B, :C].set(code.astype(bf16))

    grid = (B_p // block_m, V_p // block_n)

    compiler_kwargs = dict(dimension_semantics=("parallel", "arbitrary"))
    if vmem_limit_bytes is not None:
        # For non-toy H/V sizes pass this explicitly (default scoped VMEM is
        # 16/32 MiB on v5e/v6e-v7x) and re-derive block_n against it.
        compiler_kwargs["vmem_limit_bytes"] = vmem_limit_bytes

    def build(single_buffer_weights):
        # W1/b1 are grid-invariant: a second pipeline buffer for them is pure
        # VMEM waste, so request single buffering when supported.
        inv = ({"pipeline_mode": pl.Buffered(1)}
               if single_buffer_weights else {})
        in_specs = [
            pl.BlockSpec((block_m, C_p), lambda i, j: (i, 0)),        # code tile
            pl.BlockSpec((C_p, H_p), lambda i, j: (0, 0), **inv),     # W1 (resident)
            pl.BlockSpec((1, H_p), lambda i, j: (0, 0), **inv),       # b1
            pl.BlockSpec((H_p, block_n), lambda i, j: (0, j)),        # W2 column tile
            pl.BlockSpec((1, block_n), lambda i, j: (0, j)),          # b2 tile
        ]
        out_specs = pl.BlockSpec((block_m, block_n), lambda i, j: (i, j))
        return pl.pallas_call(
            _user_delta_kernel,
            out_shape=jax.ShapeDtypeStruct((B_p, V_p), out_dtype),
            grid_spec=pltpu.PrefetchScalarGridSpec(
                num_scalar_prefetch=0,
                grid=grid,
                in_specs=in_specs,
                out_specs=out_specs,
                scratch_shapes=[pltpu.VMEM((block_m, H_p), bf16)],
            ),
            compiler_params=pltpu.CompilerParams(**compiler_kwargs),
        )

    try:
        out = build(True)(code_p, w1_p, b1_p, w2_p, b2_p)
    except Exception:
        # pl.Buffered(1) not honored by this jax/Mosaic version: drop the hint.
        out = build(False)(code_p, w1_p, b1_p, w2_p, b2_p)

    if B_p != B or V_p != V:
        out = out[:B, :V]
    return out


def init_params(key, code_size, hidden_size, voc_size, dtype=jnp.float32):
    """Deterministic Kaiming-normal (fan_in, relu) init like the PyTorch module."""
    k1, k2, k3, k4 = jax.random.split(key, 4)
    std1 = (2.0 / code_size) ** 0.5
    std2 = (2.0 / hidden_size) ** 0.5
    w1 = (jax.random.normal(k1, (code_size, hidden_size)) * std1).astype(dtype)
    w2 = (jax.random.normal(k2, (hidden_size, voc_size)) * std2).astype(dtype)
    # PyTorch nn.Linear leaves the (uniform) default bias init in place.
    bnd1 = 1.0 / (code_size ** 0.5)
    bnd2 = 1.0 / (hidden_size ** 0.5)
    b1 = jax.random.uniform(k3, (1, hidden_size), minval=-bnd1, maxval=bnd1).astype(dtype)
    b2 = jax.random.uniform(k4, (1, voc_size), minval=-bnd2, maxval=bnd2).astype(dtype)
    return w1, b1, w2, b2


if __name__ == "__main__":
    # Small shapes consistent with the module (hidden_size=64 fixed in train.py;
    # code_size/voc_size come from the loaded tensors — use small stand-ins).
    batch = 8
    code_size = 32
    hidden_size = 64
    voc_size = 32

    key = jax.random.PRNGKey(0)
    k_code, k_dc, k_param = jax.random.split(key, 3)

    code = jax.random.normal(k_code, (batch, code_size), dtype=jnp.float32)
    d_constraint = jax.random.normal(k_dc, (batch, voc_size), dtype=jnp.float32)
    params = init_params(k_param, code_size, hidden_size, voc_size)

    # One-time weight prep (pad + bf16 cast) hoisted out of the forward path.
    prepared = prepare_params(params)
    prepared = jax.tree_util.tree_map(
        lambda x: jax.block_until_ready(x) if isinstance(x, jax.Array) else x,
        prepared)

    fwd = functools.partial(user_delta_forward, prepared=prepared)
    delta = fwd(code, d_constraint)
    jax.block_until_ready(delta)

    # Reference in plain fp32 JAX (kernel uses bf16 operands + f32 accumulate,
    # so compare with bf16-level tolerance).
    w1, b1, w2, b2 = params
    ref = jnp.maximum(code @ w1 + b1, 0.0) @ w2 + b2
    assert delta.shape == (batch, voc_size)
    assert delta.dtype == code.dtype
    assert jnp.allclose(delta, ref, atol=2e-2, rtol=2e-2), (
        float(jnp.max(jnp.abs(delta - ref))))

    print("KERNEL_OK")
</pallas_src>

<mosaic_0001>
module attributes {stable_mosaic.version = 11 : i64} {
  func.func @_user_delta_kernel(%arg0: i32, %arg1: i32, %arg2: memref<16x128xbf16, #tpu.memory_space<vmem>>, %arg3: memref<128x128xbf16, #tpu.memory_space<vmem>>, %arg4: memref<1x128xf32, #tpu.memory_space<vmem>>, %arg5: memref<128x128xbf16, #tpu.memory_space<vmem>>, %arg6: memref<1x128xf32, #tpu.memory_space<vmem>>, %arg7: memref<16x128xf32, #tpu.memory_space<vmem>>, %arg8: memref<16x128xbf16, #tpu.memory_space<vmem>>) attributes {dimension_semantics = [#tpu.dimension_semantics<parallel>, #tpu.dimension_semantics<arbitrary>], iteration_bounds = array<i64: 1, 1>, scalar_prefetch = 0 : i64, scratch_operands = 1 : i64, tpu.core_type = #tpu.core_type<tc>, window_params = [{transform_indices = @transform_0, window_bounds = array<i64: 16, 128>}, {pipeline_mode = #tpu.pipeline_mode<synchronous>, transform_indices = @transform_1, window_bounds = array<i64: 128, 128>}, {pipeline_mode = #tpu.pipeline_mode<synchronous>, transform_indices = @transform_2, window_bounds = array<i64: 1, 128>}, {transform_indices = @transform_3, window_bounds = array<i64: 128, 128>}, {transform_indices = @transform_4, window_bounds = array<i64: 1, 128>}, {transform_indices = @transform_5, window_bounds = array<i64: 16, 128>}]} {
    %c0_i32 = arith.constant 0 : i32
    %0 = arith.cmpi eq, %arg1, %c0_i32 : i32
    %1 = arith.extui %0 : i1 to i32
    %c0_i32_0 = arith.constant 0 : i32
    %2 = arith.cmpi ne, %1, %c0_i32_0 : i32
    scf.if %2 {
      %c0_8 = arith.constant 0 : index
      %c0_9 = arith.constant 0 : index
      %10 = vector.load %arg2[%c0_8, %c0_9] : memref<16x128xbf16, #tpu.memory_space<vmem>>, vector<16x128xbf16>
      %c0_10 = arith.constant 0 : index
      %c0_11 = arith.constant 0 : index
      %11 = vector.load %arg3[%c0_10, %c0_11] : memref<128x128xbf16, #tpu.memory_space<vmem>>, vector<128x128xbf16>
      %cst_12 = arith.constant dense<0.000000e+00> : vector<16x128xf32>
      %12 = tpu.matmul %10, %11, %cst_12 {dimension_numbers = #tpu.dot_dimension_numbers<[1], [0], [0], [1], [0, 0, 1, 1], [], []>} : vector<16x128xbf16>, vector<128x128xbf16>, vector<16x128xf32> -> vector<16x128xf32>
      %c0_13 = arith.constant 0 : index
      %c0_14 = arith.constant 0 : index
      %13 = vector.load %arg4[%c0_13, %c0_14] : memref<1x128xf32, #tpu.memory_space<vmem>>, vector<1x128xf32>
      %14 = vector.broadcast %13 : vector<1x128xf32> to vector<16x128xf32>
      %15 = arith.addf %12, %14 : vector<16x128xf32>
      %cst_15 = arith.constant 0.000000e+00 : f32
      %16 = vector.broadcast %cst_15 : f32 to vector<16x128xf32>
      %17 = arith.maximumf %15, %16 : vector<16x128xf32>
      %18 = arith.truncf %17 : vector<16x128xf32> to vector<16x128xbf16>
      %c0_16 = arith.constant 0 : index
      %c0_17 = arith.constant 0 : index
      %19 = vector.load %arg8[%c0_16, %c0_17] : memref<16x128xbf16, #tpu.memory_space<vmem>>, vector<16x128xbf16>
      tpu.vector_store %arg8[%c0_16, %c0_17], %18 {strides = array<i32>} : memref<16x128xbf16, #tpu.memory_space<vmem>>, vector<16x128xbf16>,
    } else {
    }
    %c0 = arith.constant 0 : index
    %c0_1 = arith.constant 0 : index
    %3 = vector.load %arg8[%c0, %c0_1] : memref<16x128xbf16, #tpu.memory_space<vmem>>, vector<16x128xbf16>
    %c0_2 = arith.constant 0 : index
    %c0_3 = arith.constant 0 : index
    %4 = vector.load %arg5[%c0_2, %c0_3] : memref<128x128xbf16, #tpu.memory_space<vmem>>, vector<128x128xbf16>
    %cst = arith.constant dense<0.000000e+00> : vector<16x128xf32>
    %5 = tpu.matmul %3, %4, %cst {dimension_numbers = #tpu.dot_dimension_numbers<[1], [0], [0], [1], [0, 0, 1, 1], [], []>} : vector<16x128xbf16>, vector<128x128xbf16>, vector<16x128xf32> -> vector<16x128xf32>
    %c0_4 = arith.constant 0 : index
    %c0_5 = arith.constant 0 : index
    %6 = vector.load %arg6[%c0_4, %c0_5] : memref<1x128xf32, #tpu.memory_space<vmem>>, vector<1x128xf32>
    %7 = vector.broadcast %6 : vector<1x128xf32> to vector<16x128xf32>
    %8 = arith.addf %5, %7 : vector<16x128xf32>
    %c0_6 = arith.constant 0 : index
    %c0_7 = arith.constant 0 : index
    %9 = vector.load %arg7[%c0_6, %c0_7] : memref<16x128xf32, #tpu.memory_space<vmem>>, vector<16x128xf32>
    tpu.vector_store %arg7[%c0_6, %c0_7], %8 {strides = array<i32>} : memref<16x128xf32, #tpu.memory_space<vmem>>, vector<16x128xf32>,
    return
  }
  func.func @transform_0(%arg0: i32, %arg1: i32) -> (i32, i32) {
    %c0_i32 = arith.constant 0 : i32
    %c0_i32_0 = arith.constant 0 : i32
    return %arg0, %c0_i32 : i32, i32
  }
  func.func @transform_1(%arg0: i32, %arg1: i32) -> (i32, i32) {
    %c0_i32 = arith.constant 0 : i32
    %c0_i32_0 = arith.constant 0 : i32
    %c0_i32_1 = arith.constant 0 : i32
    return %c0_i32, %c0_i32_0 : i32, i32
  }
  func.func @transform_2(%arg0: i32, %arg1: i32) -> (i32, i32) {
    %c0_i32 = arith.constant 0 : i32
    %c0_i32_0 = arith.constant 0 : i32
    %c0_i32_1 = arith.constant 0 : i32
    return %c0_i32, %c0_i32_0 : i32, i32
  }
  func.func @transform_3(%arg0: i32, %arg1: i32) -> (i32, i32) {
    %c0_i32 = arith.constant 0 : i32
    %c0_i32_0 = arith.constant 0 : i32
    return %c0_i32, %arg1 : i32, i32
  }
  func.func @transform_4(%arg0: i32, %arg1: i32) -> (i32, i32) {
    %c0_i32 = arith.constant 0 : i32
    %c0_i32_0 = arith.constant 0 : i32
    return %c0_i32, %arg1 : i32, i32
  }
  func.func @transform_5(%arg0: i32, %arg1: i32) -> (i32, i32) {
    %c0_i32 = arith.constant 0 : i32
    return %arg0, %arg1 : i32, i32
  }
}

module attributes {stable_mosaic.version = 11 : i64} {
  func.func @_user_delta_kernel(%arg0: i32, %arg1: i32, %arg2: memref<16x128xbf16, #tpu.memory_space<vmem>>, %arg3: memref<128x128xbf16, #tpu.memory_space<vmem>>, %arg4: memref<1x128xf32, #tpu.memory_space<vmem>>, %arg5: memref<128x128xbf16, #tpu.memory_space<vmem>>, %arg6: memref<1x128xf32, #tpu.memory_space<vmem>>, %arg7: memref<16x128xf32, #tpu.memory_space<vmem>>, %arg8: memref<16x128xbf16, #tpu.memory_space<vmem>>) attributes {dimension_semantics = [#tpu.dimension_semantics<parallel>, #tpu.dimension_semantics<arbitrary>], iteration_bounds = array<i64: 1, 1>, scalar_prefetch = 0 : i64, scratch_operands = 1 : i64, tpu.core_type = #tpu.core_type<tc>, window_params = [{transform_indices = @transform_0, window_bounds = array<i64: 16, 128>}, {pipeline_mode = #tpu.pipeline_mode<synchronous>, transform_indices = @transform_1, window_bounds = array<i64: 128, 128>}, {pipeline_mode = #tpu.pipeline_mode<synchronous>, transform_indices = @transform_2, window_bounds = array<i64: 1, 128>}, {transform_indices = @transform_3, window_bounds = array<i64: 128, 128>}, {transform_indices = @transform_4, window_bounds = array<i64: 1, 128>}, {transform_indices = @transform_5, window_bounds = array<i64: 16, 128>}]} {
    %c0_i32 = arith.constant 0 : i32
    %0 = arith.cmpi eq, %arg1, %c0_i32 : i32
    %1 = arith.extui %0 : i1 to i32
    %c0_i32_0 = arith.constant 0 : i32
    %2 = arith.cmpi ne, %1, %c0_i32_0 : i32
    scf.if %2 {
      %c0_8 = arith.constant 0 : index
      %c0_9 = arith.constant 0 : index
      %10 = vector.load %arg2[%c0_8, %c0_9] : memref<16x128xbf16, #tpu.memory_space<vmem>>, vector<16x128xbf16>
      %c0_10 = arith.constant 0 : index
      %c0_11 = arith.constant 0 : index
      %11 = vector.load %arg3[%c0_10, %c0_11] : memref<128x128xbf16, #tpu.memory_space<vmem>>, vector<128x128xbf16>
      %cst_12 = arith.constant dense<0.000000e+00> : vector<16x128xf32>
      %12 = tpu.matmul %10, %11, %cst_12 {dimension_numbers = #tpu.dot_dimension_numbers<[1], [0], [0], [1], [0, 0, 1, 1], [], []>} : vector<16x128xbf16>, vector<128x128xbf16>, vector<16x128xf32> -> vector<16x128xf32>
      %c0_13 = arith.constant 0 : index
      %c0_14 = arith.constant 0 : index
      %13 = vector.load %arg4[%c0_13, %c0_14] : memref<1x128xf32, #tpu.memory_space<vmem>>, vector<1x128xf32>
      %14 = vector.broadcast %13 : vector<1x128xf32> to vector<16x128xf32>
      %15 = arith.addf %12, %14 : vector<16x128xf32>
      %cst_15 = arith.constant 0.000000e+00 : f32
      %16 = vector.broadcast %cst_15 : f32 to vector<16x128xf32>
      %17 = arith.maximumf %15, %16 : vector<16x128xf32>
      %18 = arith.truncf %17 : vector<16x128xf32> to vector<16x128xbf16>
      %c0_16 = arith.constant 0 : index
      %c0_17 = arith.constant 0 : index
      %19 = vector.load %arg8[%c0_16, %c0_17] : memref<16x128xbf16, #tpu.memory_space<vmem>>, vector<16x128xbf16>
      tpu.vector_store %arg8[%c0_16, %c0_17], %18 {strides = array<i32>} : memref<16x128xbf16, #tpu.memory_space<vmem>>, vector<16x128xbf16>,
    } else {
    }
    %c0 = arith.constant 0 : index
    %c0_1 = arith.constant 0 : index
    %3 = vector.load %arg8[%c0, %c0_1] : memref<16x128xbf16, #tpu.memory_space<vmem>>, vector<16x128xbf16>
    %c0_2 = arith.constant 0 : index
    %c0_3 = arith.constant 0 : index
    %4 = vector.load %arg5[%c0_2, %c0_3] : memref<128x128xbf16, #tpu.memory_space<vmem>>, vector<128x128xbf16>
    %cst = arith.constant dense<0.000000e+00> : vector<16x128xf32>
    %5 = tpu.matmul %3, %4, %cst {dimension_numbers = #tpu.dot_dimension_numbers<[1], [0], [0], [1], [0, 0, 1, 1], [], []>} : vector<16x128xbf16>, vector<128x128xbf16>, vector<16x128xf32> -> vector<16x128xf32>
    %c0_4 = arith.constant 0 : index
    %c0_5 = arith.constant 0 : index
    %6 = vector.load %arg6[%c0_4, %c0_5] : memref<1x128xf32, #tpu.memory_space<vmem>>, vector<1x128xf32>
    %7 = vector.broadcast %6 : vector<1x128xf32> to vector<16x128xf32>
    %8 = arith.addf %5, %7 : vector<16x128xf32>
    %c0_6 = arith.constant 0 : index
    %c0_7 = arith.constant 0 : index
    %9 = vector.load %arg7[%c0_6, %c0_7] : memref<16x128xf32, #tpu.memory_space<vmem>>, vector<16x128xf32>
    tpu.vector_store %arg7[%c0_6, %c0_7], %8 {strides = array<i32>} : memref<16x128xf32, #tpu.memory_space<vmem>>, vector<16x128xf32>,
    return
  }
  func.func @transform_0(%arg0: i32, %arg1: i32) -> (i32, i32) {
    %c0_i32 = arith.constant 0 : i32
    %c0_i32_0 = arith.constant 0 : i32
    return %arg0, %c0_i32 : i32, i32
  }
  func.func @transform_1(%arg0: i32, %arg1: i32) -> (i32, i32) {
    %c0_i32 = arith.constant 0 : i32
    %c0_i32_0 = arith.constant 0 : i32
    %c0_i32_1 = arith.constant 0 : i32
    return %c0_i32, %c0_i32_0 : i32, i32
  }
  func.func @transform_2(%arg0: i32, %arg1: i32) -> (i32, i32) {
    %c0_i32 = arith.constant 0 : i32
    %c0_i32_0 = arith.constant 0 : i32
    %c0_i32_1 = arith.constant 0 : i32
    return %c0_i32, %c0_i32_0 : i32, i32
  }
  func.func @transform_3(%arg0: i32, %arg1: i32) -> (i32, i32) {
    %c0_i32 = arith.constant 0 : i32
    %c0_i32_0 = arith.constant 0 : i32
    return %c0_i32, %arg1 : i32, i32
  }
  func.func @transform_4(%arg0: i32, %arg1: i32) -> (i32, i32) {
    %c0_i32 = arith.constant 0 : i32
    %c0_i32_0 = arith.constant 0 : i32
    return %c0_i32, %arg1 : i32, i32
  }
  func.func @transform_5(%arg0: i32, %arg1: i32) -> (i32, i32) {
    %c0_i32 = arith.constant 0 : i32
    return %arg0, %arg1 : i32, i32
  }
}

</mosaic_0001>

<bundles_post_ra>
// kernel: tpu_custom_call.1
= control target key start
LH: loop header
LB: loop body
LE: loop exit
PB: predicated region body
PF: predicated region fallthrough
CT: control target
= control target key end

     0   :  { %10 = vsyncpa [#allocation4], 0  ;;  %s632_s0 = inlined_call_operand.hbm [shape: bf16[16,128], index: 0, kind: input, shape index: {}]   ;;  %s633_s1 = inlined_call_operand.hbm [shape: bf16[128,128], index: 1, kind: input, shape index: {}]   ;;  %s634_s2 = inlined_call_operand.vmem [shape: f32[1,128], index: 2, kind: input, shape index: {}]   ;;  %s635_s3 = inlined_call_operand.hbm [shape: bf16[128,128], index: 3, kind: input, shape index: {}]   ;;  %s636_s4 = inlined_call_operand.vmem [shape: f32[1,128], index: 4, kind: input, shape index: {}]   ;;  %s637_s5 = inlined_call_operand.hbm [shape: f32[16,128], index: 5, kind: output, shape index: {}]  }
   0x1   :  { %11 = vsyncpa [#allocation7], 0 }
   0x2   :  { %12 = vsyncpa [#allocation5], 0  ;;  %s522_s18 = smov [#allocation6]   ;;  %s523_s20 = smov [#allocation3]  }
   0x3   :  { %s30_s19 = sshll.u32 %s522_s18, 4  ;;  %s18_s21 = sshll.u32 %s523_s20, 4  ;;  %s31_s19 = int_to_ptr.vmem [resolvable:$true] %s30_s19  ;;  %s562_s21 = int_to_ptr.vmem [resolvable:$true] %s18_s21 }
   0x4   :  { %s428_s24 = scalar_lea.hbm %s633_s1, 1024 }
   0x5   :  { %p429_p0 = scmp.ne.s32.totalorder %s633_s1, %s428_s24  ;;  %p432_p1 = scmp.lt.u32.totalorder %s428_s24, %s633_s1 }
   0x7   :  { %p434_p2 = pnand %p432_p1, %p429_p0 }
   0x9   :  { %437 = shalt.err (!%p434_p2)
}
   0xa   :  { %s438_s29 = scalar_lea.vmem %s31_s19, 1024  ;;  %p443_p4 = scmp.lt.s32.totalorder %s31_s19, %s31_s19 }
   0xb   :  { %p439_p3 = scmp.ne.s32.totalorder %s31_s19, %s438_s29  ;;  %p444_p5 = scmp.lt.s32.totalorder %s438_s29, %s438_s29 }
   0xd   :  { %p445_p6 = por %p444_p5, %p443_p4 }
   0xf   :  { %p446_p7 = pnand %p445_p6, %p439_p3 }
  0x11   :  { %449 = shalt.err (!%p446_p7)
}
  0x12   :  { %s524_s30 = smov 64   ;;  %s525_s6 = smov 4  }
  0x13   :  { %36 = dma.hbm_to_vmem [thread:$0]  %s633_s1, 1024, %s31_s19, [#allocation7], %s524_s30, %s524_s30, %s525_s6  }
  0x14   :  { %s450_s11 = scalar_lea.hbm %s632_s0, 128 }
  0x15   :  { %p451_p8 = scmp.ne.s32.totalorder %s632_s0, %s450_s11  ;;  %p454_p9 = scmp.lt.u32.totalorder %s450_s11, %s632_s0 }
  0x17   :  { %p456_p10 = pnand %p454_p9, %p451_p8 }
  0x19   :  { %459 = shalt.err (!%p456_p10)
}
  0x1a   :  { %s460_s16 = scalar_lea.vmem %s562_s21, 128  ;;  %p465_p12 = scmp.lt.s32.totalorder %s562_s21, %s562_s21 }
  0x1b   :  { %p461_p11 = scmp.ne.s32.totalorder %s562_s21, %s460_s16  ;;  %p466_p13 = scmp.lt.s32.totalorder %s460_s16, %s460_s16 }
  0x1d   :  { %p467_p0 = por %p466_p13, %p465_p12 }
  0x1f   :  { %p468_p1 = pnand %p467_p0, %p461_p11 }
  0x21   :  { %471 = shalt.err (!%p468_p1)
}
  0x22   :  { %24 = dma.hbm_to_vmem [thread:$0]  %s632_s0, 128, %s562_s21, [#allocation4], %s524_s30, %s524_s30, %s525_s6  }
  0x23   :  { %s526_s18 = smov [#allocation8]   ;;  %s472_s23 = scalar_lea.hbm %s635_s3, 1024 }
  0x24   :  { %s44_s19 = sshll.u32 %s526_s18, 4  ;;  %p473_p2 = scmp.ne.s32.totalorder %s635_s3, %s472_s23  ;;  %s45_s19 = int_to_ptr.vmem [resolvable:$true] %s44_s19 }
  0x25   :  { %p476_p3 = scmp.lt.u32.totalorder %s472_s23, %s635_s3 }
  0x27   :  { %p478_p4 = pnand %p476_p3, %p473_p2 }
  0x29   :  { %481 = shalt.err (!%p478_p4)
}
  0x2a   :  { %s482_s28 = scalar_lea.vmem %s45_s19, 1024  ;;  %p487_p6 = scmp.lt.s32.totalorder %s45_s19, %s45_s19 }
  0x2b   :  { %p483_p5 = scmp.ne.s32.totalorder %s45_s19, %s482_s28  ;;  %p488_p7 = scmp.lt.s32.totalorder %s482_s28, %s482_s28 }
  0x2d   :  { %p489_p8 = por %p488_p7, %p487_p6 }
  0x2f   :  { %p490_p9 = pnand %p489_p8, %p483_p5 }
  0x31   :  { %493 = shalt.err (!%p490_p9)
}
  0x32   :  { %50 = dma.hbm_to_vmem [thread:$0]  %s635_s3, 1024, %s45_s19, [#allocation7], %s524_s30, %s524_s30, %s525_s6  }
  0x33   :  { %516 = dma.done.wait [#allocation4], 128  }
  0x34   :  { %517 = vsyncadd [#allocation4], 4294967168 }
  0x35   :  { %518 = dma.done.wait [#allocation7], 2048  }
  0x36   :  { %519 = vsyncadd [#allocation7], 4294965248  ;;  %v527_v0 = vmov 0.0   ;;  %vm528_vm0 = vmmov 0   ;;  %v411_v1 = vld [vmem:[#allocation6] sm:$0xff]   ;;  %v412_v2 = vld [vmem:[#allocation6 + $0x8] sm:$0xff]  }
  0x37   :  { %361 = vmatprep.subr.bf16.mxu0 %v527_v0  ;;  %377 = vmatprep.mubr.msk.bf16.mxu0 %vm528_vm0, %v527_v0  ;;  %v413_v3 = vld [vmem:[#allocation6 + $0x10] sm:$0xff]   ;;  %v420_v4 = vld [vmem:[#allocation8] sm:$0xff]   ;;  %v414_v5 = vld [vmem:[#allocation6 + $0x18] sm:$0xff]   ;;  %s529_s7 = smov [#allocation9]  }
  0x38   :  { %381 = vmatprep.subr.bf16.mxu1 %v527_v0  ;;  %397 = vmatprep.mubr.msk.bf16.mxu1 %vm528_vm0, %v527_v0  ;;  %v421_v6 = vld [vmem:[#allocation8 + $0x8] sm:$0xff]   ;;  %v415_v7 = vld [vmem:[#allocation6 + $0x20] sm:$0xff]   ;;  %v422_v8 = vld [vmem:[#allocation8 + $0x10] sm:$0xff]   ;;  %s311_s8 = sshll.u32 %s529_s7, 4  ;;  %s312_s8 = int_to_ptr.vmem [resolvable:$true] %s311_s8 }
  0x39   :  { %362 = vmatpush3.bf16.msra.mxu0 %v411_v1  ;;  %382 = vmatpush3.bf16.msra.mxu1 %v420_v4  ;;  %v416_v9 = vld [vmem:[#allocation6 + $0x28] sm:$0xff]   ;;  %v423_v10 = vld [vmem:[#allocation8 + $0x18] sm:$0xff]   ;;  %v417_v11 = vld [vmem:[#allocation6 + $0x30] sm:$0xff]   ;;  %p499_p11 = scmp.lt.s32.totalorder %s312_s8, %s312_s8 }
  0x3a   :  { %363 = vmatprep.subr.bf16.mxu0 %v527_v0  ;;  %383 = vmatprep.subr.bf16.mxu1 %v527_v0  ;;  %v424_v12 = vld [vmem:[#allocation8 + $0x20] sm:$0xff]   ;;  %v418_v13 = vld [vmem:[#allocation6 + $0x38] sm:$0xff]   ;;  %v425_v14 = vld [vmem:[#allocation8 + $0x28] sm:$0xff]  }
  0x3b   :  { %v419_v15 = vld [vmem:[#allocation3] sm:$0xff]   ;;  %v426_v16 = vld [vmem:[#allocation8 + $0x30] sm:$0xff]  }
  0x3c   :  { %v427_v17 = vld [vmem:[#allocation8 + $0x38] sm:$0xff]  }
  0x3d   :  { %364 = vmatpush3.bf16.msra.mxu0 %v412_v2  ;;  %384 = vmatpush3.bf16.msra.mxu1 %v421_v6  ;;  %v324_v18 = vld [vmem:[%s634_s2] ss:$0 sm:$0xff]  ;;  %s494_s2 = scalar_lea.vmem %s312_s8, 256 }
  0x3e   :  { %365 = vmatprep.subr.bf16.mxu0 %v527_v0  ;;  %385 = vmatprep.subr.bf16.mxu1 %v527_v0  ;;  %v334_v28 = vld [vmem:[%s636_s4] ss:$0 sm:$0xff]  ;;  %p495_p10 = scmp.ne.s32.totalorder %s312_s8, %s494_s2  ;;  %p500_p12 = scmp.lt.s32.totalorder %s494_s2, %s494_s2 }
  0x40   :  { %p501_p13 = por %p500_p12, %p499_p11 }
  0x41   :  { %366 = vmatpush3.bf16.msra.mxu0 %v413_v3  ;;  %386 = vmatpush3.bf16.msra.mxu1 %v422_v8 }
  0x42   :  { %367 = vmatprep.subr.bf16.mxu0 %v527_v0  ;;  %387 = vmatprep.subr.bf16.mxu1 %v527_v0  ;;  %p502_p0 = pnand %p501_p13, %p495_p10 }
  0x45   :  { %368 = vmatpush3.bf16.msra.mxu0 %v414_v5  ;;  %388 = vmatpush3.bf16.msra.mxu1 %v423_v10 }
  0x46   :  { %369 = vmatprep.subr.bf16.mxu0 %v527_v0  ;;  %389 = vmatprep.subr.bf16.mxu1 %v527_v0 }
  0x49   :  { %370 = vmatpush3.bf16.msra.mxu0 %v415_v7  ;;  %390 = vmatpush3.bf16.msra.mxu1 %v424_v12 }
  0x4a   :  { %371 = vmatprep.subr.bf16.mxu0 %v527_v0  ;;  %391 = vmatprep.subr.bf16.mxu1 %v527_v0 }
  0x4d   :  { %372 = vmatpush3.bf16.msra.mxu0 %v416_v9  ;;  %392 = vmatpush3.bf16.msra.mxu1 %v425_v14 }
  0x4e   :  { %373 = vmatprep.subr.bf16.mxu0 %v527_v0  ;;  %393 = vmatprep.subr.bf16.mxu1 %v527_v0 }
  0x51   :  { %374 = vmatpush3.bf16.msra.mxu0 %v417_v11  ;;  %394 = vmatpush3.bf16.msra.mxu1 %v426_v16 }
  0x52   :  { %375 = vmatprep.subr.bf16.mxu0 %v527_v0  ;;  %395 = vmatprep.subr.bf16.mxu1 %v527_v0 }
  0x55   :  { %376 = vmatpush3.bf16.msra.mxu0 %v418_v13  ;;  %396 = vmatpush3.bf16.msra.mxu1 %v427_v17 }
  0x58   :  { %378 = vmatmul.mubr.bf16.vlgmr.msra.gmra.mrb[0].mxu0 %v419_v15 }
 0x12b   :  { %v180_v19 = vpop.f32.mrb[0].mxu0 }
 0x12c   :  { %v181_v20 = vadd.f32 %v324_v18, %v180_v19  ;;  %v379_v21 = vpop.f32.mrb[1].mxu0 }
 0x12d   :  { %v183_v22 = vpop.f32.mrb[2].mxu0 }
 0x12e   :  { %v184_v23 = vadd.f32 %v324_v18, %v183_v22  ;;  %v380_v24 = vpop.f32.mrb[3].mxu0  ;;  %v187_v25 = vmax.f32 %v181_v20, 0.0 }
 0x130   :  { %v188_v26 = vmax.f32 %v184_v23, 0.0 }
 0x132   :  { %v189_v27 = vpack.c.bf16 %v188_v26, %v187_v25 }
 0x134   :  { %398 = vmatmul.mubr.bf16.vlgmr.msra.gmra.mrb[0].mxu1 %v189_v27 }
 0x207   :  { %v297_v29 = vpop.f32.mrb[0].mxu1 }
 0x208   :  { %v298_v30 = vadd.f32 %v334_v28, %v297_v29  ;;  %v399_v31 = vpop.f32.mrb[1].mxu1 }
 0x209   :  { %v300_v32 = vpop.f32.mrb[2].mxu1 }
 0x20a   :  { %304 = vst [vmem:[#allocation9] sm:$0xff] %v298_v30  ;;  %v301_v33 = vadd.f32 %v334_v28, %v300_v32  ;;  %v400_v34 = vpop.f32.mrb[3].mxu1 }
 0x20c   :  { %305 = vst [vmem:[#allocation9 + $0x8] sm:$0xff] %v301_v33 }
 0x20d   :  { %505 = shalt.err (!%p502_p0)
}
 0x20e   :  { %s506_s10 = scalar_lea.hbm %s637_s5, 256 }
 0x20f   :  { %p507_p1 = scmp.ne.s32.totalorder %s637_s5, %s506_s10  ;;  %p510_p2 = scmp.lt.u32.totalorder %s506_s10, %s637_s5 }
 0x211   :  { %p512_p3 = pnand %p510_p2, %p507_p1 }
 0x213   :  { %515 = shalt.err (!%p512_p3)
}
 0x214   :  { %s530_s15 = smov 128   ;;  %s531_s16 = smov 8  }
 0x215   :  { %317 = dma.vmem_to_hbm [thread:$0]  %s312_s8, 256, %s637_s5, [#allocation5], %s530_s15, %s530_s15, %s531_s16  }
 0x216   :  { %520 = dma.done.wait [#allocation5], 256  }
 0x217   :  { %521 = vsyncadd [#allocation5], 4294967040 }
 0x218   :  { %321 = vsyncpa [#allocation4], 1 }
 0x219   :  { %322 = vsyncpa [#allocation7], 1 }
 0x21a   :  { %323 = vsyncpa [#allocation5], 1 }

// kernel: tpu_custom_call.1
= control target key start
LH: loop header
LB: loop body
LE: loop exit
PB: predicated region body
PF: predicated region fallthrough
CT: control target
= control target key end

     0   :  { %10 = vsyncpa [#allocation4], 0  ;;  %s632_s0 = inlined_call_operand.hbm [shape: bf16[16,128], index: 0, kind: input, shape index: {}]   ;;  %s633_s1 = inlined_call_operand.hbm [shape: bf16[128,128], index: 1, kind: input, shape index: {}]   ;;  %s634_s2 = inlined_call_operand.vmem [shape: f32[1,128], index: 2, kind: input, shape index: {}]   ;;  %s635_s3 = inlined_call_operand.hbm [shape: bf16[128,128], index: 3, kind: input, shape index: {}]   ;;  %s636_s4 = inlined_call_operand.vmem [shape: f32[1,128], index: 4, kind: input, shape index: {}]   ;;  %s637_s5 = inlined_call_operand.hbm [shape: f32[16,128], index: 5, kind: output, shape index: {}]  }
   0x1   :  { %11 = vsyncpa [#allocation7], 0 }
   0x2   :  { %12 = vsyncpa [#allocation5], 0  ;;  %s522_s18 = smov [#allocation6]   ;;  %s523_s20 = smov [#allocation3]  }
   0x3   :  { %s30_s19 = sshll.u32 %s522_s18, 4  ;;  %s18_s21 = sshll.u32 %s523_s20, 4  ;;  %s31_s19 = int_to_ptr.vmem [resolvable:$true] %s30_s19  ;;  %s562_s21 = int_to_ptr.vmem [resolvable:$true] %s18_s21 }
   0x4   :  { %s428_s24 = scalar_lea.hbm %s633_s1, 1024 }
   0x5   :  { %p429_p0 = scmp.ne.s32.totalorder %s633_s1, %s428_s24  ;;  %p432_p1 = scmp.lt.u32.totalorder %s428_s24, %s633_s1 }
   0x7   :  { %p434_p2 = pnand %p432_p1, %p429_p0 }
   0x9   :  { %437 = shalt.err (!%p434_p2)
}
   0xa   :  { %s438_s29 = scalar_lea.vmem %s31_s19, 1024  ;;  %p443_p4 = scmp.lt.s32.totalorder %s31_s19, %s31_s19 }
   0xb   :  { %p439_p3 = scmp.ne.s32.totalorder %s31_s19, %s438_s29  ;;  %p444_p5 = scmp.lt.s32.totalorder %s438_s29, %s438_s29 }
   0xd   :  { %p445_p6 = por %p444_p5, %p443_p4 }
   0xf   :  { %p446_p7 = pnand %p445_p6, %p439_p3 }
  0x11   :  { %449 = shalt.err (!%p446_p7)
}
  0x12   :  { %s524_s30 = smov 64   ;;  %s525_s6 = smov 4  }
  0x13   :  { %36 = dma.hbm_to_vmem [thread:$0]  %s633_s1, 1024, %s31_s19, [#allocation7], %s524_s30, %s524_s30, %s525_s6  }
  0x14   :  { %s450_s11 = scalar_lea.hbm %s632_s0, 128 }
  0x15   :  { %p451_p8 = scmp.ne.s32.totalorder %s632_s0, %s450_s11  ;;  %p454_p9 = scmp.lt.u32.totalorder %s450_s11, %s632_s0 }
  0x17   :  { %p456_p10 = pnand %p454_p9, %p451_p8 }
  0x19   :  { %459 = shalt.err (!%p456_p10)
}
  0x1a   :  { %s460_s16 = scalar_lea.vmem %s562_s21, 128  ;;  %p465_p12 = scmp.lt.s32.totalorder %s562_s21, %s562_s21 }
  0x1b   :  { %p461_p11 = scmp.ne.s32.totalorder %s562_s21, %s460_s16  ;;  %p466_p13 = scmp.lt.s32.totalorder %s460_s16, %s460_s16 }
  0x1d   :  { %p467_p0 = por %p466_p13, %p465_p12 }
  0x1f   :  { %p468_p1 = pnand %p467_p0, %p461_p11 }
  0x21   :  { %471 = shalt.err (!%p468_p1)
}
  0x22   :  { %24 = dma.hbm_to_vmem [thread:$0]  %s632_s0, 128, %s562_s21, [#allocation4], %s524_s30, %s524_s30, %s525_s6  }
  0x23   :  { %s526_s18 = smov [#allocation8]   ;;  %s472_s23 = scalar_lea.hbm %s635_s3, 1024 }
  0x24   :  { %s44_s19 = sshll.u32 %s526_s18, 4  ;;  %p473_p2 = scmp.ne.s32.totalorder %s635_s3, %s472_s23  ;;  %s45_s19 = int_to_ptr.vmem [resolvable:$true] %s44_s19 }
  0x25   :  { %p476_p3 = scmp.lt.u32.totalorder %s472_s23, %s635_s3 }
  0x27   :  { %p478_p4 = pnand %p476_p3, %p473_p2 }
  0x29   :  { %481 = shalt.err (!%p478_p4)
}
  0x2a   :  { %s482_s28 = scalar_lea.vmem %s45_s19, 1024  ;;  %p487_p6 = scmp.lt.s32.totalorder %s45_s19, %s45_s19 }
  0x2b   :  { %p483_p5 = scmp.ne.s32.totalorder %s45_s19, %s482_s28  ;;  %p488_p7 = scmp.lt.s32.totalorder %s482_s28, %s482_s28 }
  0x2d   :  { %p489_p8 = por %p488_p7, %p487_p6 }
  0x2f   :  { %p490_p9 = pnand %p489_p8, %p483_p5 }
  0x31   :  { %493 = shalt.err (!%p490_p9)
}
  0x32   :  { %50 = dma.hbm_to_vmem [thread:$0]  %s635_s3, 1024, %s45_s19, [#allocation7], %s524_s30, %s524_s30, %s525_s6  }
  0x33   :  { %516 = dma.done.wait [#allocation4], 128  }
  0x34   :  { %517 = vsyncadd [#allocation4], 4294967168 }
  0x35   :  { %518 = dma.done.wait [#allocation7], 2048  }
  0x36   :  { %519 = vsyncadd [#allocation7], 4294965248  ;;  %v527_v0 = vmov 0.0   ;;  %vm528_vm0 = vmmov 0   ;;  %v411_v1 = vld [vmem:[#allocation6] sm:$0xff]   ;;  %v412_v2 = vld [vmem:[#allocation6 + $0x8] sm:$0xff]  }
  0x37   :  { %361 = vmatprep.subr.bf16.mxu0 %v527_v0  ;;  %377 = vmatprep.mubr.msk.bf16.mxu0 %vm528_vm0, %v527_v0  ;;  %v413_v3 = vld [vmem:[#allocation6 + $0x10] sm:$0xff]   ;;  %v420_v4 = vld [vmem:[#allocation8] sm:$0xff]   ;;  %v414_v5 = vld [vmem:[#allocation6 + $0x18] sm:$0xff]   ;;  %s529_s7 = smov [#allocation9]  }
  0x38   :  { %381 = vmatprep.subr.bf16.mxu1 %v527_v0  ;;  %397 = vmatprep.mubr.msk.bf16.mxu1 %vm528_vm0, %v527_v0  ;;  %v421_v6 = vld [vmem:[#allocation8 + $0x8] sm:$0xff]   ;;  %v415_v7 = vld [vmem:[#allocation6 + $0x20] sm:$0xff]   ;;  %v422_v8 = vld [vmem:[#allocation8 + $0x10] sm:$0xff]   ;;  %s311_s8 = sshll.u32 %s529_s7, 4  ;;  %s312_s8 = int_to_ptr.vmem [resolvable:$true] %s311_s8 }
  0x39   :  { %362 = vmatpush3.bf16.msra.mxu0 %v411_v1  ;;  %382 = vmatpush3.bf16.msra.mxu1 %v420_v4  ;;  %v416_v9 = vld [vmem:[#allocation6 + $0x28] sm:$0xff]   ;;  %v423_v10 = vld [vmem:[#allocation8 + $0x18] sm:$0xff]   ;;  %v417_v11 = vld [vmem:[#allocation6 + $0x30] sm:$0xff]   ;;  %p499_p11 = scmp.lt.s32.totalorder %s312_s8, %s312_s8 }
  0x3a   :  { %363 = vmatprep.subr.bf16.mxu0 %v527_v0  ;;  %383 = vmatprep.subr.bf16.mxu1 %v527_v0  ;;  %v424_v12 = vld [vmem:[#allocation8 + $0x20] sm:$0xff]   ;;  %v418_v13 = vld [vmem:[#allocation6 + $0x38] sm:$0xff]   ;;  %v425_v14 = vld [vmem:[#allocation8 + $0x28] sm:$0xff]  }
  0x3b   :  { %v419_v15 = vld [vmem:[#allocation3] sm:$0xff]   ;;  %v426_v16 = vld [vmem:[#allocation8 + $0x30] sm:$0xff]  }
  0x3c   :  { %v427_v17 = vld [vmem:[#allocation8 + $0x38] sm:$0xff]  }
  0x3d   :  { %364 = vmatpush3.bf16.msra.mxu0 %v412_v2  ;;  %384 = vmatpush3.bf16.msra.mxu1 %v421_v6  ;;  %v324_v18 = vld [vmem:[%s634_s2] ss:$0 sm:$0xff]  ;;  %s494_s2 = scalar_lea.vmem %s312_s8, 256 }
  0x3e   :  { %365 = vmatprep.subr.bf16.mxu0 %v527_v0  ;;  %385 = vmatprep.subr.bf16.mxu1 %v527_v0  ;;  %v334_v28 = vld [vmem:[%s636_s4] ss:$0 sm:$0xff]  ;;  %p495_p10 = scmp.ne.s32.totalorder %s312_s8, %s494_s2  ;;  %p500_p12 = scmp.lt.s32.totalorder %s494_s2, %s494_s2 }
  0x40   :  { %p501_p13 = por %p500_p12, %p499_p11 }
  0x41   :  { %366 = vmatpush3.bf16.msra.mxu0 %v413_v3  ;;  %386 = vmatpush3.bf16.msra.mxu1 %v422_v8 }
  0x42   :  { %367 = vmatprep.subr.bf16.mxu0 %v527_v0  ;;  %387 = vmatprep.subr.bf16.mxu1 %v527_v0  ;;  %p502_p0 = pnand %p501_p13, %p495_p10 }
  0x45   :  { %368 = vmatpush3.bf16.msra.mxu0 %v414_v5  ;;  %388 = vmatpush3.bf16.msra.mxu1 %v423_v10 }
  0x46   :  { %369 = vmatprep.subr.bf16.mxu0 %v527_v0  ;;  %389 = vmatprep.subr.bf16.mxu1 %v527_v0 }
  0x49   :  { %370 = vmatpush3.bf16.msra.mxu0 %v415_v7  ;;  %390 = vmatpush3.bf16.msra.mxu1 %v424_v12 }
  0x4a   :  { %371 = vmatprep.subr.bf16.mxu0 %v527_v0  ;;  %391 = vmatprep.subr.bf16.mxu1 %v527_v0 }
  0x4d   :  { %372 = vmatpush3.bf16.msra.mxu0 %v416_v9  ;;  %392 = vmatpush3.bf16.msra.mxu1 %v425_v14 }
  0x4e   :  { %373 = vmatprep.subr.bf16.mxu0 %v527_v0  ;;  %393 = vmatprep.subr.bf16.mxu1 %v527_v0 }
  0x51   :  { %374 = vmatpush3.bf16.msra.mxu0 %v417_v11  ;;  %394 = vmatpush3.bf16.msra.mxu1 %v426_v16 }
  0x52   :  { %375 = vmatprep.subr.bf16.mxu0 %v527_v0  ;;  %395 = vmatprep.subr.bf16.mxu1 %v527_v0 }
  0x55   :  { %376 = vmatpush3.bf16.msra.mxu0 %v418_v13  ;;  %396 = vmatpush3.bf16.msra.mxu1 %v427_v17 }
  0x58   :  { %378 = vmatmul.mubr.bf16.vlgmr.msra.gmra.mrb[0].mxu0 %v419_v15 }
 0x12b   :  { %v180_v19 = vpop.f32.mrb[0].mxu0 }
 0x12c   :  { %v181_v20 = vadd.f32 %v324_v18, %v180_v19  ;;  %v379_v21 = vpop.f32.mrb[1].mxu0 }
 0x12d   :  { %v183_v22 = vpop.f32.mrb[2].mxu0 }
 0x12e   :  { %v184_v23 = vadd.f32 %v324_v18, %v183_v22  ;;  %v380_v24 = vpop.f32.mrb[3].mxu0  ;;  %v187_v25 = vmax.f32 %v181_v20, 0.0 }
 0x130   :  { %v188_v26 = vmax.f32 %v184_v23, 0.0 }
 0x132   :  { %v189_v27 = vpack.c.bf16 %v188_v26, %v187_v25 }
 0x134   :  { %398 = vmatmul.mubr.bf16.vlgmr.msra.gmra.mrb[0].mxu1 %v189_v27 }
 0x207   :  { %v297_v29 = vpop.f32.mrb[0].mxu1 }
 0x208   :  { %v298_v30 = vadd.f32 %v334_v28, %v297_v29  ;;  %v399_v31 = vpop.f32.mrb[1].mxu1 }
 0x209   :  { %v300_v32 = vpop.f32.mrb[2].mxu1 }
 0x20a   :  { %304 = vst [vmem:[#allocation9] sm:$0xff] %v298_v30  ;;  %v301_v33 = vadd.f32 %v334_v28, %v300_v32  ;;  %v400_v34 = vpop.f32.mrb[3].mxu1 }
 0x20c   :  { %305 = vst [vmem:[#allocation9 + $0x8] sm:$0xff] %v301_v33 }
 0x20d   :  { %505 = shalt.err (!%p502_p0)
}
 0x20e   :  { %s506_s10 = scalar_lea.hbm %s637_s5, 256 }
 0x20f   :  { %p507_p1 = scmp.ne.s32.totalorder %s637_s5, %s506_s10  ;;  %p510_p2 = scmp.lt.u32.totalorder %s506_s10, %s637_s5 }
 0x211   :  { %p512_p3 = pnand %p510_p2, %p507_p1 }
 0x213   :  { %515 = shalt.err (!%p512_p3)
}
 0x214   :  { %s530_s15 = smov 128   ;;  %s531_s16 = smov 8  }
 0x215   :  { %317 = dma.vmem_to_hbm [thread:$0]  %s312_s8, 256, %s637_s5, [#allocation5], %s530_s15, %s530_s15, %s531_s16  }
 0x216   :  { %520 = dma.done.wait [#allocation5], 256  }
 0x217   :  { %521 = vsyncadd [#allocation5], 4294967040 }
 0x218   :  { %321 = vsyncpa [#allocation4], 1 }
 0x219   :  { %322 = vsyncpa [#allocation7], 1 }
 0x21a   :  { %323 = vsyncpa [#allocation5], 1 }

</bundles_post_ra>
